<compile_context>
chip_gen: v5e
topology: v5e:2x2
jax: 0.10.0
libtpu: 0.0.40
codegen_flags: <defaults>
</compile_context>

<pallas_src>
import functools

import jax
import jax.numpy as jnp
from jax.experimental import pallas as pl
from jax.experimental.pallas import tpu as pltpu

_LANE = 128
_SUBLANE = 8


def _round_up(x, m):
    return ((x + m - 1) // m) * m


def _tile_plan(n, f):
    """Pick (padded N, row tile, K tile, padded F) for the given problem size."""
    fp = _round_up(f, _LANE)
    if n <= 512:
        np_ = _round_up(n, _LANE)   # single tile in both grid axes
        tn = tk = np_
    else:
        tn = 512                    # ~85% of HBM roofline territory for mem-bound tiles
        tk = 512                    # sweepable 512..2048; keeps A block at 0.5 MiB bf16
        np_ = _round_up(n, 2 * tn)  # even # of row tiles -> both v7x TCs get work
    return np_, tn, tk, fp


def _vmem_limit_bytes(tn, tk, fp, fout, out_itemsize, w_cols):
    """Explicit scoped-VMEM request derived from the double-buffered blocks."""
    n_buf = 2                                   # default double buffering
    total = n_buf * tn * tk * 2                 # A tiles (bf16)
    total += n_buf * tk * fp * 2                # M (XW1 or H) tiles (bf16)
    total += n_buf * fp * w_cols * 2            # resident weight (layer 2 only)
    total += n_buf * fout * 4                   # bias (f32)
    total += n_buf * tn * fout * out_itemsize   # output tiles
    total += tn * fp * 4                        # f32 accumulator scratch
    total = int(total * 1.5) + (4 << 20)        # headroom for compiler scratch
    return max(min(total, 64 << 20), 32 << 20)  # cap at v7x physical VMEM


# ----------------------------------------------------------------------------
# Layer 1 kernel:  out[i] = relu( sum_k A[i,k] @ XW1[k] + b1 )
#   grid = (N/tn, N/tk); f32 accumulator in VMEM scratch; output written once
#   at the last K step (output block index constant along K -> stays resident).
# ----------------------------------------------------------------------------
def _prop_bias_relu_kernel(a_ref, m_ref, b_ref, out_ref, acc_ref):
    @pl.when(pl.program_id(1) == 0)
    def _():
        acc_ref[...] = jnp.zeros_like(acc_ref)

    acc_ref[...] += jnp.dot(a_ref[...], m_ref[...],
                            preferred_element_type=jnp.float32)

    @pl.when(pl.program_id(1) == pl.num_programs(1) - 1)
    def _():
        out_ref[...] = jnp.maximum(acc_ref[...] + b_ref[...], 0.0).astype(out_ref.dtype)


def _gcn_propagate_relu(a_bf, m_bf, b_f32, *, tn, tk):
    np_, _ = a_bf.shape
    _, fp = m_bf.shape
    grid = (np_ // tn, np_ // tk)
    return pl.pallas_call(
        _prop_bias_relu_kernel,
        out_shape=jax.ShapeDtypeStruct((np_, fp), jnp.bfloat16),
        grid=grid,
        in_specs=[
            # NOTE: if the A DMA becomes exposed for small tk, deepen with
            # pipeline_mode=pl.Buffered(3) on this spec only.
            pl.BlockSpec((tn, tk), lambda i, k: (i, k)),   # streamed A tile
            pl.BlockSpec((tk, fp), lambda i, k: (k, 0)),   # streamed XW1 tile
            pl.BlockSpec((1, fp), lambda i, k: (0, 0)),    # resident bias
        ],
        out_specs=pl.BlockSpec((tn, fp), lambda i, k: (i, 0)),
        scratch_shapes=[pltpu.VMEM((tn, fp), jnp.float32)],
        compiler_params=pltpu.CompilerParams(
            dimension_semantics=("parallel", "arbitrary"),
            vmem_limit_bytes=_vmem_limit_bytes(tn, tk, fp, fp, 2, 0)),
    )(a_bf, m_bf, b_f32)


# ----------------------------------------------------------------------------
# Layer 2 kernel:  out[i] = ( sum_k A[i,k] @ H[k] ) @ [W2a|W2b] + [b2a|b2b]
#   A@H accumulated once in f32 scratch; single lane-dense (tn, 2*fp) store.
# ----------------------------------------------------------------------------
def _prop_project_kernel(a_ref, m_ref, w_ref, b_ref, out_ref, acc_ref):
    @pl.when(pl.program_id(1) == 0)
    def _():
        acc_ref[...] = jnp.zeros_like(acc_ref)

    acc_ref[...] += jnp.dot(a_ref[...], m_ref[...],
                            preferred_element_type=jnp.float32)

    @pl.when(pl.program_id(1) == pl.num_programs(1) - 1)
    def _():
        out_ref[...] = (jnp.dot(acc_ref[...].astype(jnp.bfloat16), w_ref[...],
                                preferred_element_type=jnp.float32)
                        + b_ref[...]).astype(out_ref.dtype)


def _gcn_propagate_project(a_bf, m_bf, w_bf, b_f32, *, tn, tk):
    np_, _ = a_bf.shape
    _, fp = m_bf.shape
    _, fout = w_bf.shape
    grid = (np_ // tn, np_ // tk)
    return pl.pallas_call(
        _prop_project_kernel,
        out_shape=jax.ShapeDtypeStruct((np_, fout), jnp.float32),
        grid=grid,
        in_specs=[
            pl.BlockSpec((tn, tk), lambda i, k: (i, k)),   # streamed A tile
            pl.BlockSpec((tk, fp), lambda i, k: (k, 0)),   # streamed H tile
            pl.BlockSpec((fp, fout), lambda i, k: (0, 0)),  # resident [W2a|W2b]
            pl.BlockSpec((1, fout), lambda i, k: (0, 0)),   # resident [b2a|b2b]
        ],
        out_specs=pl.BlockSpec((tn, fout), lambda i, k: (i, 0)),
        scratch_shapes=[pltpu.VMEM((tn, fp), jnp.float32)],
        compiler_params=pltpu.CompilerParams(
            dimension_semantics=("parallel", "arbitrary"),
            vmem_limit_bytes=_vmem_limit_bytes(tn, tk, fp, fout, 4, fout)),
    )(a_bf, m_bf, w_bf, b_f32)


# ----------------------------------------------------------------------------
# One-time setup: pad + cast A_hat and parameters (hoisted out of the per-call
# jitted forward so the O(N^2) pad/bf16-cast of A is not paid every step).
# ----------------------------------------------------------------------------
def _pad2(arr, rows, cols):
    return jnp.pad(arr, ((0, rows - arr.shape[0]), (0, cols - arr.shape[1])))


def prepare_encoder(a_hat, params, num_nodes, feat_dim):
    np_, tn, tk, fp = _tile_plan(num_nodes, feat_dim)
    a_bf = _pad2(a_hat, np_, np_).astype(jnp.bfloat16)
    w1_bf = _pad2(params["w1"], fp, fp).astype(jnp.bfloat16)
    b1 = _pad2(params["b1"], 1, fp).astype(jnp.float32)
    # Concatenate mu / logstd branches for a single lane-dense matmul + store.
    w2ab_bf = jnp.concatenate(
        [_pad2(params["w2a"], fp, fp), _pad2(params["w2b"], fp, fp)], axis=1
    ).astype(jnp.bfloat16)
    b2ab = jnp.concatenate(
        [_pad2(params["b2a"], 1, fp), _pad2(params["b2b"], 1, fp)], axis=1
    ).astype(jnp.float32)
    return {
        "a": a_bf, "w1": w1_bf, "b1": b1, "w2ab": w2ab_bf, "b2ab": b2ab,
        "n": num_nodes, "f": feat_dim, "np": np_, "tn": tn, "tk": tk, "fp": fp,
    }


@functools.partial(jax.jit, static_argnames=("n", "f", "np_", "tn", "tk", "fp"))
def _encoder_forward(a_bf, w1_bf, b1, w2ab_bf, b2ab, x, *, n, f, np_, tn, tk, fp):
    # Pad X to (Np, Fp); zero padding keeps all padded contractions exact.
    x_bf = jnp.pad(x, ((0, np_ - n), (0, fp - f))).astype(jnp.bfloat16)
    # Tiny wrapper-side matmul (matches PyTorch's X@W-then-propagate ordering).
    xw1_bf = jnp.dot(x_bf, w1_bf,
                     preferred_element_type=jnp.float32).astype(jnp.bfloat16)
    # Layer 1: H = relu(A @ XW1 + b1), stored bf16.
    # NOTE: padded rows of H equal relu(b1) != 0; they never contribute because
    # the corresponding (padded) columns of A are zero.
    h_bf = _gcn_propagate_relu(a_bf, xw1_bf, b1, tn=tn, tk=tk)
    # Layer 2: [mu | logstd] = (A @ H) @ [W2a | W2b] + [b2a | b2b].
    out = _gcn_propagate_project(a_bf, h_bf, w2ab_bf, b2ab, tn=tn, tk=tk)
    mu = out[:n, :f]
    logstd = out[:n, fp:fp + f]
    return mu, logstd


def encoder_forward(enc, x):
    return _encoder_forward(
        enc["a"], enc["w1"], enc["b1"], enc["w2ab"], enc["b2ab"], x,
        n=enc["n"], f=enc["f"], np_=enc["np"],
        tn=enc["tn"], tk=enc["tk"], fp=enc["fp"])


# ----------------------------------------------------------------------------
# Plain-JAX glue: dense normalized adjacency (GCN norm) and parameter init.
# ----------------------------------------------------------------------------
def build_normalized_adjacency(edge_index, num_nodes):
    """A_hat = D^-1/2 (A + I) D^-1/2 as a dense [N, N] float32 matrix.

    Note: edges are inserted src->dst only (no symmetrization) — this matches
    GCN normalization when edge_index already contains both directions
    (torch_geometric convention)."""
    src, dst = edge_index[0], edge_index[1]
    adj = jnp.zeros((num_nodes, num_nodes), jnp.float32)
    adj = adj.at[src, dst].set(1.0)           # duplicate edges collapse to 1
    adj = adj + jnp.eye(num_nodes, dtype=jnp.float32)
    deg = jnp.sum(adj, axis=1)
    d_inv_sqrt = jnp.where(deg > 0, 1.0 / jnp.sqrt(deg), 0.0)
    return adj * d_inv_sqrt[:, None] * d_inv_sqrt[None, :]


def init_params(key, feat_dim):
    def glorot(k, shape):
        limit = jnp.sqrt(6.0 / (shape[0] + shape[1]))
        return jax.random.uniform(k, shape, jnp.float32, -limit, limit)

    k1, k2, k3 = jax.random.split(key, 3)
    f = feat_dim
    return {
        "w1":  glorot(k1, (f, f)), "b1":  jnp.zeros((1, f), jnp.float32),
        "w2a": glorot(k2, (f, f)), "b2a": jnp.zeros((1, f), jnp.float32),
        "w2b": glorot(k3, (f, f)), "b2b": jnp.zeros((1, f), jnp.float32),
    }


def encoder_reference(a_hat, x, p):
    """Pure-JAX reference following the same bf16-operand / f32-accum path."""
    a = a_hat.astype(jnp.bfloat16)
    xw1 = jnp.dot(x.astype(jnp.bfloat16), p["w1"].astype(jnp.bfloat16),
                  preferred_element_type=jnp.float32).astype(jnp.bfloat16)
    h = jnp.maximum(
        jnp.dot(a, xw1, preferred_element_type=jnp.float32) + p["b1"], 0.0
    ).astype(jnp.bfloat16)
    ah = jnp.dot(a, h, preferred_element_type=jnp.float32).astype(jnp.bfloat16)
    mu = jnp.dot(ah, p["w2a"].astype(jnp.bfloat16),
                 preferred_element_type=jnp.float32) + p["b2a"]
    logstd = jnp.dot(ah, p["w2b"].astype(jnp.bfloat16),
                     preferred_element_type=jnp.float32) + p["b2b"]
    return mu, logstd


if __name__ == "__main__":
    key = jax.random.PRNGKey(0)
    k_x, k_e, k_p = jax.random.split(key, 3)

    num_nodes = 16
    feat_dim = 32
    num_edges = 48

    x = jax.random.normal(k_x, (num_nodes, feat_dim), jnp.float32)
    edge_index = jax.random.randint(k_e, (2, num_edges), 0, num_nodes, jnp.int32)
    ind = jnp.arange(num_nodes)  # unused by the forward pass (matches PyTorch)

    a_hat = build_normalized_adjacency(edge_index, num_nodes)
    params = init_params(k_p, feat_dim)

    enc = prepare_encoder(a_hat, params, num_nodes, feat_dim)  # one-time pad/cast
    mu, logstd = encoder_forward(enc, x)
    jax.block_until_ready((mu, logstd))

    mu_ref, logstd_ref = encoder_reference(a_hat, x, params)
    assert mu.shape == (num_nodes, feat_dim) and logstd.shape == (num_nodes, feat_dim)
    # bf16 MXU operands with f32 accumulation -> loosened tolerance vs f32-exact.
    assert jnp.allclose(mu, mu_ref, atol=2e-2, rtol=2e-2)
    assert jnp.allclose(logstd, logstd_ref, atol=2e-2, rtol=2e-2)

    print("KERNEL_OK")
</pallas_src>

<mosaic_0001>
module attributes {stable_mosaic.version = 11 : i64} {
  func.func @_prop_bias_relu_kernel(%arg0: i32, %arg1: i32, %arg2: memref<128x128xbf16, #tpu.memory_space<vmem>>, %arg3: memref<128x128xbf16, #tpu.memory_space<vmem>>, %arg4: memref<1x128xf32, #tpu.memory_space<vmem>>, %arg5: memref<128x128xbf16, #tpu.memory_space<vmem>>, %arg6: memref<128x128xf32, #tpu.memory_space<vmem>>) attributes {dimension_semantics = [#tpu.dimension_semantics<parallel>, #tpu.dimension_semantics<arbitrary>], iteration_bounds = array<i64: 1, 1>, scalar_prefetch = 0 : i64, scratch_operands = 1 : i64, tpu.core_type = #tpu.core_type<tc>, window_params = [{transform_indices = @transform_0, window_bounds = array<i64: 128, 128>}, {transform_indices = @transform_1, window_bounds = array<i64: 128, 128>}, {pipeline_mode = #tpu.pipeline_mode<synchronous>, transform_indices = @transform_2, window_bounds = array<i64: 1, 128>}, {transform_indices = @transform_3, window_bounds = array<i64: 128, 128>}]} {
    %c0_i32 = arith.constant 0 : i32
    %0 = arith.cmpi eq, %arg1, %c0_i32 : i32
    %1 = arith.extui %0 : i1 to i32
    %c0_i32_0 = arith.constant 0 : i32
    %2 = arith.cmpi ne, %1, %c0_i32_0 : i32
    scf.if %2 {
      %cst_10 = arith.constant 0.000000e+00 : f32
      %12 = vector.broadcast %cst_10 : f32 to vector<128x128xf32>
      %c0_11 = arith.constant 0 : index
      %c0_12 = arith.constant 0 : index
      %13 = vector.load %arg6[%c0_11, %c0_12] : memref<128x128xf32, #tpu.memory_space<vmem>>, vector<128x128xf32>
      tpu.vector_store %arg6[%c0_11, %c0_12], %12 {strides = array<i32>} : memref<128x128xf32, #tpu.memory_space<vmem>>, vector<128x128xf32>,
    } else {
    }
    %c0 = arith.constant 0 : index
    %c0_1 = arith.constant 0 : index
    %3 = vector.load %arg6[%c0, %c0_1] : memref<128x128xf32, #tpu.memory_space<vmem>>, vector<128x128xf32>
    %c0_2 = arith.constant 0 : index
    %c0_3 = arith.constant 0 : index
    %4 = vector.load %arg2[%c0_2, %c0_3] : memref<128x128xbf16, #tpu.memory_space<vmem>>, vector<128x128xbf16>
    %c0_4 = arith.constant 0 : index
    %c0_5 = arith.constant 0 : index
    %5 = vector.load %arg3[%c0_4, %c0_5] : memref<128x128xbf16, #tpu.memory_space<vmem>>, vector<128x128xbf16>
    %cst = arith.constant dense<0.000000e+00> : vector<128x128xf32>
    %6 = tpu.matmul %4, %5, %cst {dimension_numbers = #tpu.dot_dimension_numbers<[1], [0], [0], [1], [0, 0, 1, 1], [], []>} : vector<128x128xbf16>, vector<128x128xbf16>, vector<128x128xf32> -> vector<128x128xf32>
    %7 = arith.addf %3, %6 : vector<128x128xf32>
    %c0_6 = arith.constant 0 : index
    %c0_7 = arith.constant 0 : index
    %8 = vector.load %arg6[%c0_6, %c0_7] : memref<128x128xf32, #tpu.memory_space<vmem>>, vector<128x128xf32>
    tpu.vector_store %arg6[%c0_6, %c0_7], %7 {strides = array<i32>} : memref<128x128xf32, #tpu.memory_space<vmem>>, vector<128x128xf32>,
    %c0_i32_8 = arith.constant 0 : i32
    %9 = arith.cmpi eq, %arg1, %c0_i32_8 : i32
    %10 = arith.extui %9 : i1 to i32
    %c0_i32_9 = arith.constant 0 : i32
    %11 = arith.cmpi ne, %10, %c0_i32_9 : i32
    scf.if %11 {
      %c0_10 = arith.constant 0 : index
      %c0_11 = arith.constant 0 : index
      %12 = vector.load %arg6[%c0_10, %c0_11] : memref<128x128xf32, #tpu.memory_space<vmem>>, vector<128x128xf32>
      %c0_12 = arith.constant 0 : index
      %c0_13 = arith.constant 0 : index
      %13 = vector.load %arg4[%c0_12, %c0_13] : memref<1x128xf32, #tpu.memory_space<vmem>>, vector<1x128xf32>
      %14 = vector.broadcast %13 : vector<1x128xf32> to vector<128x128xf32>
      %15 = arith.addf %12, %14 : vector<128x128xf32>
      %cst_14 = arith.constant 0.000000e+00 : f32
      %16 = vector.broadcast %cst_14 : f32 to vector<128x128xf32>
      %17 = arith.maximumf %15, %16 : vector<128x128xf32>
      %18 = arith.truncf %17 : vector<128x128xf32> to vector<128x128xbf16>
      %c0_15 = arith.constant 0 : index
      %c0_16 = arith.constant 0 : index
      %19 = vector.load %arg5[%c0_15, %c0_16] : memref<128x128xbf16, #tpu.memory_space<vmem>>, vector<128x128xbf16>
      tpu.vector_store %arg5[%c0_15, %c0_16], %18 {strides = array<i32>} : memref<128x128xbf16, #tpu.memory_space<vmem>>, vector<128x128xbf16>,
    } else {
    }
    return
  }
  func.func @transform_0(%arg0: i32, %arg1: i32) -> (i32, i32) {
    %c0_i32 = arith.constant 0 : i32
    return %arg0, %arg1 : i32, i32
  }
  func.func @transform_1(%arg0: i32, %arg1: i32) -> (i32, i32) {
    %c0_i32 = arith.constant 0 : i32
    %c0_i32_0 = arith.constant 0 : i32
    return %arg1, %c0_i32 : i32, i32
  }
  func.func @transform_2(%arg0: i32, %arg1: i32) -> (i32, i32) {
    %c0_i32 = arith.constant 0 : i32
    %c0_i32_0 = arith.constant 0 : i32
    %c0_i32_1 = arith.constant 0 : i32
    return %c0_i32, %c0_i32_0 : i32, i32
  }
  func.func @transform_3(%arg0: i32, %arg1: i32) -> (i32, i32) {
    %c0_i32 = arith.constant 0 : i32
    %c0_i32_0 = arith.constant 0 : i32
    return %arg0, %c0_i32 : i32, i32
  }
}

module attributes {stable_mosaic.version = 11 : i64} {
  func.func @_prop_project_kernel(%arg0: i32, %arg1: i32, %arg2: memref<128x128xbf16, #tpu.memory_space<vmem>>, %arg3: memref<128x128xbf16, #tpu.memory_space<vmem>>, %arg4: memref<128x256xbf16, #tpu.memory_space<vmem>>, %arg5: memref<1x256xf32, #tpu.memory_space<vmem>>, %arg6: memref<128x256xf32, #tpu.memory_space<vmem>>, %arg7: memref<128x128xf32, #tpu.memory_space<vmem>>) attributes {dimension_semantics = [#tpu.dimension_semantics<parallel>, #tpu.dimension_semantics<arbitrary>], iteration_bounds = array<i64: 1, 1>, scalar_prefetch = 0 : i64, scratch_operands = 1 : i64, tpu.core_type = #tpu.core_type<tc>, window_params = [{transform_indices = @transform_0, window_bounds = array<i64: 128, 128>}, {transform_indices = @transform_1, window_bounds = array<i64: 128, 128>}, {pipeline_mode = #tpu.pipeline_mode<synchronous>, transform_indices = @transform_2, window_bounds = array<i64: 128, 256>}, {pipeline_mode = #tpu.pipeline_mode<synchronous>, transform_indices = @transform_3, window_bounds = array<i64: 1, 256>}, {transform_indices = @transform_4, window_bounds = array<i64: 128, 256>}]} {
    %c0_i32 = arith.constant 0 : i32
    %0 = arith.cmpi eq, %arg1, %c0_i32 : i32
    %1 = arith.extui %0 : i1 to i32
    %c0_i32_0 = arith.constant 0 : i32
    %2 = arith.cmpi ne, %1, %c0_i32_0 : i32
    scf.if %2 {
      %cst_10 = arith.constant 0.000000e+00 : f32
      %12 = vector.broadcast %cst_10 : f32 to vector<128x128xf32>
      %c0_11 = arith.constant 0 : index
      %c0_12 = arith.constant 0 : index
      %13 = vector.load %arg7[%c0_11, %c0_12] : memref<128x128xf32, #tpu.memory_space<vmem>>, vector<128x128xf32>
      tpu.vector_store %arg7[%c0_11, %c0_12], %12 {strides = array<i32>} : memref<128x128xf32, #tpu.memory_space<vmem>>, vector<128x128xf32>,
    } else {
    }
    %c0 = arith.constant 0 : index
    %c0_1 = arith.constant 0 : index
    %3 = vector.load %arg7[%c0, %c0_1] : memref<128x128xf32, #tpu.memory_space<vmem>>, vector<128x128xf32>
    %c0_2 = arith.constant 0 : index
    %c0_3 = arith.constant 0 : index
    %4 = vector.load %arg2[%c0_2, %c0_3] : memref<128x128xbf16, #tpu.memory_space<vmem>>, vector<128x128xbf16>
    %c0_4 = arith.constant 0 : index
    %c0_5 = arith.constant 0 : index
    %5 = vector.load %arg3[%c0_4, %c0_5] : memref<128x128xbf16, #tpu.memory_space<vmem>>, vector<128x128xbf16>
    %cst = arith.constant dense<0.000000e+00> : vector<128x128xf32>
    %6 = tpu.matmul %4, %5, %cst {dimension_numbers = #tpu.dot_dimension_numbers<[1], [0], [0], [1], [0, 0, 1, 1], [], []>} : vector<128x128xbf16>, vector<128x128xbf16>, vector<128x128xf32> -> vector<128x128xf32>
    %7 = arith.addf %3, %6 : vector<128x128xf32>
    %c0_6 = arith.constant 0 : index
    %c0_7 = arith.constant 0 : index
    %8 = vector.load %arg7[%c0_6, %c0_7] : memref<128x128xf32, #tpu.memory_space<vmem>>, vector<128x128xf32>
    tpu.vector_store %arg7[%c0_6, %c0_7], %7 {strides = array<i32>} : memref<128x128xf32, #tpu.memory_space<vmem>>, vector<128x128xf32>,
    %c0_i32_8 = arith.constant 0 : i32
    %9 = arith.cmpi eq, %arg1, %c0_i32_8 : i32
    %10 = arith.extui %9 : i1 to i32
    %c0_i32_9 = arith.constant 0 : i32
    %11 = arith.cmpi ne, %10, %c0_i32_9 : i32
    scf.if %11 {
      %c0_10 = arith.constant 0 : index
      %c0_11 = arith.constant 0 : index
      %12 = vector.load %arg7[%c0_10, %c0_11] : memref<128x128xf32, #tpu.memory_space<vmem>>, vector<128x128xf32>
      %13 = arith.truncf %12 : vector<128x128xf32> to vector<128x128xbf16>
      %c0_12 = arith.constant 0 : index
      %c0_13 = arith.constant 0 : index
      %14 = vector.load %arg4[%c0_12, %c0_13] : memref<128x256xbf16, #tpu.memory_space<vmem>>, vector<128x256xbf16>
      %cst_14 = arith.constant dense<0.000000e+00> : vector<128x256xf32>
      %15 = tpu.matmul %13, %14, %cst_14 {dimension_numbers = #tpu.dot_dimension_numbers<[1], [0], [0], [1], [0, 0, 1, 1], [], []>} : vector<128x128xbf16>, vector<128x256xbf16>, vector<128x256xf32> -> vector<128x256xf32>
      %c0_15 = arith.constant 0 : index
      %c0_16 = arith.constant 0 : index
      %16 = vector.load %arg5[%c0_15, %c0_16] : memref<1x256xf32, #tpu.memory_space<vmem>>, vector<1x256xf32>
      %17 = vector.broadcast %16 : vector<1x256xf32> to vector<128x256xf32>
      %18 = arith.addf %15, %17 : vector<128x256xf32>
      %c0_17 = arith.constant 0 : index
      %c0_18 = arith.constant 0 : index
      %19 = vector.load %arg6[%c0_17, %c0_18] : memref<128x256xf32, #tpu.memory_space<vmem>>, vector<128x256xf32>
      tpu.vector_store %arg6[%c0_17, %c0_18], %18 {strides = array<i32>} : memref<128x256xf32, #tpu.memory_space<vmem>>, vector<128x256xf32>,
    } else {
    }
    return
  }
  func.func @transform_0(%arg0: i32, %arg1: i32) -> (i32, i32) {
    %c0_i32 = arith.constant 0 : i32
    return %arg0, %arg1 : i32, i32
  }
  func.func @transform_1(%arg0: i32, %arg1: i32) -> (i32, i32) {
    %c0_i32 = arith.constant 0 : i32
    %c0_i32_0 = arith.constant 0 : i32
    return %arg1, %c0_i32 : i32, i32
  }
  func.func @transform_2(%arg0: i32, %arg1: i32) -> (i32, i32) {
    %c0_i32 = arith.constant 0 : i32
    %c0_i32_0 = arith.constant 0 : i32
    %c0_i32_1 = arith.constant 0 : i32
    return %c0_i32, %c0_i32_0 : i32, i32
  }
  func.func @transform_3(%arg0: i32, %arg1: i32) -> (i32, i32) {
    %c0_i32 = arith.constant 0 : i32
    %c0_i32_0 = arith.constant 0 : i32
    %c0_i32_1 = arith.constant 0 : i32
    return %c0_i32, %c0_i32_0 : i32, i32
  }
  func.func @transform_4(%arg0: i32, %arg1: i32) -> (i32, i32) {
    %c0_i32 = arith.constant 0 : i32
    %c0_i32_0 = arith.constant 0 : i32
    return %arg0, %c0_i32 : i32, i32
  }
}

</mosaic_0001>

<bundles_post_ra>
// kernel: _encoder_forward.2
= control target key start
LH: loop header
LB: loop body
LE: loop exit
PB: predicated region body
PF: predicated region fallthrough
CT: control target
= control target key end

     0   :  { %8 = vsyncpa [#allocation4], 0  ;;  %s548_s15 = smov [#allocation3]   ;;  %s549_s17 = smov 64   ;;  %s625_s0 = inlined_call_operand.hbm [shape: bf16[128,128], index: 0, kind: input, shape index: {}]   ;;  %s626_s1 = inlined_call_operand.vmem [shape: bf16[128,128], index: 1, kind: input, shape index: {}]   ;;  %s627_s2 = inlined_call_operand.vmem [shape: f32[1,128], index: 2, kind: input, shape index: {}]   ;;  %s628_s3 = inlined_call_operand.vmem [shape: bf16[128,128], index: 3, kind: output, shape index: {}]  }
   0x1   :  { %s13_s14 = sshll.u32 %s625_s0, 4  ;;  %s15_s16 = sshll.u32 %s548_s15, 4  ;;  %s14_s14 = int_to_ptr.hbm [resolvable:$true] %s13_s14  ;;  %s16_s16 = int_to_ptr.vmem [resolvable:$true] %s15_s16 }
   0x2   :  { %s550_s18 = smov 4  }
   0x3   :  { %21 = dma.hbm_to_vmem [thread:$0]  %s14_s14, 1024, %s16_s16, [#allocation4], %s549_s17, %s549_s17, %s550_s18  }
   0x4   :  { %546 = dma.done.wait [#allocation4], 1024  }
   0x5   :  { %547 = vsyncadd [#allocation4], 4294966272  ;;  %v446_v0 = vld [vmem:[%s626_s1 + $0x38] sm:$0xff]  ;;  %v445_v1 = vld [vmem:[%s626_s1 + $0x30] sm:$0xff] }
   0x6   :  { %194 = vmatpush.bf16.msra.mxu0 %v446_v0  ;;  %494 = vmatpush.bf16.msra.mxu1 %v446_v0  ;;  %v444_v2 = vld [vmem:[%s626_s1 + $0x28] sm:$0xff]  ;;  %v443_v3 = vld [vmem:[%s626_s1 + $0x20] sm:$0xff]  ;;  %v442_v4 = vld [vmem:[%s626_s1 + $0x18] sm:$0xff] }
   0x7   :  { %495 = vmatpush.bf16.msra.mxu2 %v446_v0  ;;  %496 = vmatpush.bf16.msra.mxu3 %v446_v0  ;;  %v441_v5 = vld [vmem:[%s626_s1 + $0x10] sm:$0xff]  ;;  %v440_v6 = vld [vmem:[%s626_s1 + $0x8] sm:$0xff]  ;;  %v439_v7 = vld [vmem:[%s626_s1] sm:$0xff] }
   0x8   :  { %v431_v8 = vld [vmem:[#allocation3] sm:$0xff]  ;;  %v433_v9 = vld [vmem:[#allocation3 + $0x10] sm:$0xff]  ;;  %v432_v12 = vld [vmem:[#allocation3 + $0x8] sm:$0xff] }
   0x9   :  { %v435_v10 = vld [vmem:[#allocation3 + $0x20] sm:$0xff]  ;;  %v437_v11 = vld [vmem:[#allocation3 + $0x30] sm:$0xff]  ;;  %v434_v13 = vld [vmem:[#allocation3 + $0x18] sm:$0xff] }
   0xa   :  { %195 = vmatpush.bf16.msra.mxu0 %v445_v1  ;;  %497 = vmatpush.bf16.msra.mxu1 %v445_v1  ;;  %v436_v14 = vld [vmem:[#allocation3 + $0x28] sm:$0xff]  ;;  %v438_v15 = vld [vmem:[#allocation3 + $0x38] sm:$0xff]  ;;  %v521_v18 = vld [vmem:[%s627_s2] ss:$0 sm:$0xff] }
   0xb   :  { %498 = vmatpush.bf16.msra.mxu2 %v445_v1  ;;  %499 = vmatpush.bf16.msra.mxu3 %v445_v1 }
   0xe   :  { %196 = vmatpush.bf16.msra.mxu0 %v444_v2  ;;  %500 = vmatpush.bf16.msra.mxu1 %v444_v2 }
   0xf   :  { %501 = vmatpush.bf16.msra.mxu2 %v444_v2  ;;  %502 = vmatpush.bf16.msra.mxu3 %v444_v2 }
  0x12   :  { %197 = vmatpush.bf16.msra.mxu0 %v443_v3  ;;  %503 = vmatpush.bf16.msra.mxu1 %v443_v3 }
  0x13   :  { %504 = vmatpush.bf16.msra.mxu2 %v443_v3  ;;  %505 = vmatpush.bf16.msra.mxu3 %v443_v3 }
  0x16   :  { %198 = vmatpush.bf16.msra.mxu0 %v442_v4  ;;  %506 = vmatpush.bf16.msra.mxu1 %v442_v4 }
  0x17   :  { %507 = vmatpush.bf16.msra.mxu2 %v442_v4  ;;  %508 = vmatpush.bf16.msra.mxu3 %v442_v4 }
  0x1a   :  { %199 = vmatpush.bf16.msra.mxu0 %v441_v5  ;;  %509 = vmatpush.bf16.msra.mxu1 %v441_v5 }
  0x1b   :  { %510 = vmatpush.bf16.msra.mxu2 %v441_v5  ;;  %511 = vmatpush.bf16.msra.mxu3 %v441_v5 }
  0x1e   :  { %200 = vmatpush.bf16.msra.mxu0 %v440_v6  ;;  %512 = vmatpush.bf16.msra.mxu1 %v440_v6 }
  0x1f   :  { %513 = vmatpush.bf16.msra.mxu2 %v440_v6  ;;  %514 = vmatpush.bf16.msra.mxu3 %v440_v6 }
  0x22   :  { %201 = vmatpush.bf16.msra.mxu0 %v439_v7  ;;  %515 = vmatpush.bf16.msra.mxu1 %v439_v7 }
  0x23   :  { %516 = vmatpush.bf16.msra.mxu2 %v439_v7  ;;  %517 = vmatpush.bf16.msra.mxu3 %v439_v7 }
  0x25   :  { %202 = vmatmul.bf16.vlgmr.msra.gmra.mxu0 %v431_v8  ;;  %212 = vmatmul.bf16.vlgmr.msra.gmra.mxu1 %v433_v9 }
  0x26   :  { %222 = vmatmul.bf16.vlgmr.msra.gmra.mxu2 %v435_v10  ;;  %232 = vmatmul.bf16.vlgmr.msra.gmra.mxu3 %v437_v11 }
  0x35   :  { %207 = vmatmul.bf16.gmra.mxu0 %v432_v12  ;;  %217 = vmatmul.bf16.gmra.mxu1 %v434_v13 }
  0x36   :  { %227 = vmatmul.bf16.gmra.mxu2 %v436_v14  ;;  %237 = vmatmul.bf16.gmra.mxu3 %v438_v15 }
  0xa2   :  { %v203_v16 = vpop.f32.mrf.mxu0  ;;  %v213_v17 = vpop.f32.mrf.mxu1 }
  0xa3   :  { %v298_v19 = vadd.f32 %v521_v18, %v203_v16  ;;  %v302_v20 = vadd.f32 %v521_v18, %v213_v17 }
  0xa5   :  { %v314_v27 = vmax.f32 %v298_v19, 0.0  ;;  %v318_v28 = vmax.f32 %v302_v20, 0.0 }
  0xa9   :  { %v223_v21 = vpop.f32.mrf.mxu2  ;;  %v233_v22 = vpop.f32.mrf.mxu3 }
  0xaa   :  { %v205_v23 = vpop.f32.mrf.mxu0  ;;  %v215_v24 = vpop.f32.mrf.mxu1  ;;  %v306_v33 = vadd.f32 %v521_v18, %v223_v21  ;;  %v310_v34 = vadd.f32 %v521_v18, %v233_v22 }
  0xab   :  { %v299_v25 = vadd.f32 %v521_v18, %v205_v23  ;;  %v303_v26 = vadd.f32 %v521_v18, %v215_v24 }
  0xac   :  { %v322_v41 = vmax.f32 %v306_v33, 0.0  ;;  %v326_v42 = vmax.f32 %v310_v34, 0.0 }
  0xad   :  { %v315_v29 = vmax.f32 %v299_v25, 0.0  ;;  %v319_v30 = vmax.f32 %v303_v26, 0.0 }
  0xaf   :  { %v450_v31 = vpack.c.bf16 %v315_v29, %v314_v27  ;;  %v460_v32 = vpack.c.bf16 %v319_v30, %v318_v28 }
  0xb1   :  { %451 = vst [vmem:[%s628_s3] sm:$0xff] %v450_v31   ;;  %v225_v35 = vpop.f32.mrf.mxu2  ;;  %v235_v36 = vpop.f32.mrf.mxu3 }
  0xb2   :  { %488 = vst [vmem:[%s628_s3 + $0x10] sm:$0xff] %v460_v32   ;;  %v307_v37 = vadd.f32 %v521_v18, %v225_v35  ;;  %v311_v38 = vadd.f32 %v521_v18, %v235_v36  ;;  %v208_v39 = vpop.f32.mrf.mxu0  ;;  %v218_v40 = vpop.f32.mrf.mxu1 }
  0xb3   :  { %v300_v47 = vadd.f32 %v521_v18, %v208_v39  ;;  %v304_v48 = vadd.f32 %v521_v18, %v218_v40 }
  0xb4   :  { %v323_v43 = vmax.f32 %v307_v37, 0.0  ;;  %v327_v44 = vmax.f32 %v311_v38, 0.0 }
  0xb5   :  { %v316_v55 = vmax.f32 %v300_v47, 0.0  ;;  %v320_v56 = vmax.f32 %v304_v48, 0.0 }
  0xb6   :  { %v470_v45 = vpack.c.bf16 %v323_v43, %v322_v41  ;;  %v480_v46 = vpack.c.bf16 %v327_v44, %v326_v42 }
  0xb8   :  { %490 = vst [vmem:[%s628_s3 + $0x20] sm:$0xff] %v470_v45  }
  0xb9   :  { %492 = vst [vmem:[%s628_s3 + $0x30] sm:$0xff] %v480_v46   ;;  %v228_v49 = vpop.f32.mrf.mxu2  ;;  %v238_v50 = vpop.f32.mrf.mxu3 }
  0xba   :  { %v210_v51 = vpop.f32.mrf.mxu0  ;;  %v220_v52 = vpop.f32.mrf.mxu1  ;;  %v308_v61 = vadd.f32 %v521_v18, %v228_v49  ;;  %v312_v62 = vadd.f32 %v521_v18, %v238_v50 }
  0xbb   :  { %v301_v53 = vadd.f32 %v521_v18, %v210_v51  ;;  %v305_v54 = vadd.f32 %v521_v18, %v220_v52 }
  0xbc   :  { %v324_v3 = vmax.f32 %v308_v61, 0.0  ;;  %v328_v4 = vmax.f32 %v312_v62, 0.0 }
  0xbd   :  { %v317_v57 = vmax.f32 %v301_v53, 0.0  ;;  %v321_v58 = vmax.f32 %v305_v54, 0.0 }
  0xbf   :  { %v455_v59 = vpack.c.bf16 %v317_v57, %v316_v55  ;;  %v465_v60 = vpack.c.bf16 %v321_v58, %v320_v56 }
  0xc1   :  { %487 = vst [vmem:[%s628_s3 + $0x8] sm:$0xff] %v455_v59   ;;  %v230_v63 = vpop.f32.mrf.mxu2  ;;  %v240_v0 = vpop.f32.mrf.mxu3 }
  0xc2   :  { %489 = vst [vmem:[%s628_s3 + $0x18] sm:$0xff] %v465_v60   ;;  %v309_v1 = vadd.f32 %v521_v18, %v230_v63  ;;  %v313_v2 = vadd.f32 %v521_v18, %v240_v0 }
  0xc4   :  { %v325_v5 = vmax.f32 %v309_v1, 0.0  ;;  %v329_v6 = vmax.f32 %v313_v2, 0.0 }
  0xc6   :  { %v475_v7 = vpack.c.bf16 %v325_v5, %v324_v3  ;;  %v485_v8 = vpack.c.bf16 %v329_v6, %v328_v4 }
  0xc8   :  { %491 = vst [vmem:[%s628_s3 + $0x28] sm:$0xff] %v475_v7  }
  0xc9   :  { %493 = vst [vmem:[%s628_s3 + $0x38] sm:$0xff] %v485_v8  }
  0xca   :  { %366 = vsyncpa [#allocation4], 1 }

// kernel: _encoder_forward.3
= control target key start
LH: loop header
LB: loop body
LE: loop exit
PB: predicated region body
PF: predicated region fallthrough
CT: control target
= control target key end

     0   :  { %9 = vsyncpa [#allocation4], 0  ;;  %s755_s18 = smov [#allocation3]   ;;  %s756_s20 = smov 64   ;;  %s1045_s0 = inlined_call_operand.hbm [shape: bf16[128,128], index: 0, kind: input, shape index: {}]   ;;  %s1046_s1 = inlined_call_operand.vmem [shape: bf16[128,128], index: 1, kind: input, shape index: {}]   ;;  %s1047_s2 = inlined_call_operand.vmem [shape: bf16[128,256], index: 2, kind: input, shape index: {}]   ;;  %s1048_s3 = inlined_call_operand.vmem [shape: f32[1,256], index: 3, kind: input, shape index: {}]   ;;  %s1049_s4 = inlined_call_operand.vmem [shape: f32[128,256], index: 4, kind: output, shape index: {}]  }
   0x1   :  { %s14_s17 = sshll.u32 %s1045_s0, 4  ;;  %s16_s19 = sshll.u32 %s755_s18, 4  ;;  %s15_s17 = int_to_ptr.hbm [resolvable:$true] %s14_s17  ;;  %s17_s19 = int_to_ptr.vmem [resolvable:$true] %s16_s19 }
   0x2   :  { %s757_s21 = smov 4  }
   0x3   :  { %22 = dma.hbm_to_vmem [thread:$0]  %s15_s17, 1024, %s17_s19, [#allocation4], %s756_s20, %s756_s20, %s757_s21  }
   0x4   :  { %753 = dma.done.wait [#allocation4], 1024  }
   0x5   :  { %754 = vsyncadd [#allocation4], 4294966272  ;;  %v685_v0 = vld [vmem:[%s1046_s1 + $0x38] sm:$0xff]  ;;  %v684_v1 = vld [vmem:[%s1046_s1 + $0x30] sm:$0xff] }
   0x6   :  { %197 = vmatpush.bf16.msra.mxu0 %v685_v0  ;;  %702 = vmatpush.bf16.msra.mxu3 %v685_v0  ;;  %v683_v2 = vld [vmem:[%s1046_s1 + $0x28] sm:$0xff]  ;;  %v682_v3 = vld [vmem:[%s1046_s1 + $0x20] sm:$0xff]  ;;  %v681_v4 = vld [vmem:[%s1046_s1 + $0x18] sm:$0xff] }
   0x7   :  { %v680_v5 = vld [vmem:[%s1046_s1 + $0x10] sm:$0xff]  ;;  %v679_v6 = vld [vmem:[%s1046_s1 + $0x8] sm:$0xff]  ;;  %v678_v7 = vld [vmem:[%s1046_s1] sm:$0xff] }
   0x8   :  { %v670_v8 = vld [vmem:[#allocation3] sm:$0xff]  ;;  %v676_v9 = vld [vmem:[#allocation3 + $0x30] sm:$0xff]  ;;  %v671_v10 = vld [vmem:[#allocation3 + $0x8] sm:$0xff] }
   0x9   :  { %v677_v11 = vld [vmem:[#allocation3 + $0x38] sm:$0xff]  ;;  %v672_v12 = vld [vmem:[#allocation3 + $0x10] sm:$0xff]  ;;  %v656_v19 = vld [vmem:[%s1047_s2 + $0x60] sm:$0xf] }
   0xa   :  { %198 = vmatpush.bf16.msra.mxu0 %v684_v1  ;;  %703 = vmatpush.bf16.msra.mxu3 %v684_v1  ;;  %v673_v13 = vld [vmem:[#allocation3 + $0x18] sm:$0xff]  ;;  %v664_v14 = vld [vmem:[%s1047_s2 + $0x70] sm:$0xf]  ;;  %v700_v16 = vld [vmem:[%s1047_s2 + $0x74] sm:$0xf] }
   0xb   :  { %v701_v15 = vld [vmem:[%s1047_s2 + $0x74] sm:$0xf0]  ;;  %v666_v18 = vld [vmem:[%s1047_s2 + $0x78] sm:$0xf0]  ;;  %v699_v20 = vld [vmem:[%s1047_s2 + $0x64] sm:$0xf0] }
   0xc   :  { %v665_v17 = vor.u32 %v701_v15, %v664_v14  ;;  %v828_v21 = vor.u32 %v700_v16, %v666_v18  ;;  %v698_v22 = vld [vmem:[%s1047_s2 + $0x64] sm:$0xf]  ;;  %v658_v23 = vld [vmem:[%s1047_s2 + $0x68] sm:$0xf0]  ;;  %v657_v24 = vor.u32 %v699_v20, %v656_v19  ;;  %v648_v26 = vld [vmem:[%s1047_s2 + $0x50] sm:$0xf] }
   0xd   :  { %v661_v25 = vor.u32 %v698_v22, %v658_v23  ;;  %v697_v27 = vld [vmem:[%s1047_s2 + $0x54] sm:$0xf0]  ;;  %v696_v28 = vld [vmem:[%s1047_s2 + $0x54] sm:$0xf]  ;;  %v650_v29 = vld [vmem:[%s1047_s2 + $0x58] sm:$0xf0] }
   0xe   :  { %199 = vmatpush.bf16.msra.mxu0 %v683_v2  ;;  %704 = vmatpush.bf16.msra.mxu3 %v683_v2  ;;  %v649_v30 = vor.u32 %v697_v27, %v648_v26  ;;  %v653_v31 = vor.u32 %v696_v28, %v650_v29  ;;  %v640_v32 = vld [vmem:[%s1047_s2 + $0x40] sm:$0xf]  ;;  %v695_v33 = vld [vmem:[%s1047_s2 + $0x44] sm:$0xf0]  ;;  %v694_v34 = vld [vmem:[%s1047_s2 + $0x44] sm:$0xf] }
   0xf   :  { %407 = vmatpush.bf16.msra.mxu1 %v665_v17  ;;  %456 = vmatpush.bf16.msra.mxu2 %v828_v21  ;;  %v642_v35 = vld [vmem:[%s1047_s2 + $0x48] sm:$0xf0]  ;;  %v641_v36 = vor.u32 %v695_v33, %v640_v32  ;;  %v674_v37 = vld [vmem:[#allocation3 + $0x20] sm:$0xff]  ;;  %v632_v39 = vld [vmem:[%s1047_s2 + $0x30] sm:$0xf] }
  0x10   :  { %v645_v38 = vor.u32 %v694_v34, %v642_v35  ;;  %v693_v40 = vld [vmem:[%s1047_s2 + $0x34] sm:$0xf0]  ;;  %v692_v41 = vld [vmem:[%s1047_s2 + $0x34] sm:$0xf]  ;;  %v634_v42 = vld [vmem:[%s1047_s2 + $0x38] sm:$0xf0] }
  0x11   :  { %v633_v43 = vor.u32 %v693_v40, %v632_v39  ;;  %v637_v44 = vor.u32 %v692_v41, %v634_v42  ;;  %v675_v45 = vld [vmem:[#allocation3 + $0x28] sm:$0xff]  ;;  %v624_v46 = vld [vmem:[%s1047_s2 + $0x20] sm:$0xf]  ;;  %v690_v48 = vld [vmem:[%s1047_s2 + $0x24] sm:$0xf] }
  0x12   :  { %200 = vmatpush.bf16.msra.mxu0 %v682_v3  ;;  %705 = vmatpush.bf16.msra.mxu3 %v682_v3  ;;  %v691_v47 = vld [vmem:[%s1047_s2 + $0x24] sm:$0xf0]  ;;  %v626_v50 = vld [vmem:[%s1047_s2 + $0x28] sm:$0xf0]  ;;  %v616_v52 = vld [vmem:[%s1047_s2 + $0x10] sm:$0xf] }
  0x13   :  { %408 = vmatpush.bf16.msra.mxu1 %v657_v24  ;;  %457 = vmatpush.bf16.msra.mxu2 %v661_v25  ;;  %v625_v49 = vor.u32 %v691_v47, %v624_v46  ;;  %v629_v51 = vor.u32 %v690_v48, %v626_v50  ;;  %v689_v53 = vld [vmem:[%s1047_s2 + $0x14] sm:$0xf0]  ;;  %v688_v54 = vld [vmem:[%s1047_s2 + $0x14] sm:$0xf]  ;;  %v618_v56 = vld [vmem:[%s1047_s2 + $0x18] sm:$0xf0] }
  0x14   :  { %v617_v55 = vor.u32 %v689_v53, %v616_v52  ;;  %v621_v57 = vor.u32 %v688_v54, %v618_v56  ;;  %v608_v58 = vld [vmem:[%s1047_s2] sm:$0xf]  ;;  %v687_v59 = vld [vmem:[%s1047_s2 + $0x4] sm:$0xf0]  ;;  %v686_v60 = vld [vmem:[%s1047_s2 + $0x4] sm:$0xf] }
  0x15   :  { %v609_v61 = vor.u32 %v687_v59, %v608_v58  ;;  %v610_v62 = vld [vmem:[%s1047_s2 + $0x8] sm:$0xf0] }
  0x16   :  { %201 = vmatpush.bf16.msra.mxu0 %v681_v4  ;;  %706 = vmatpush.bf16.msra.mxu3 %v681_v4  ;;  %v613_v63 = vor.u32 %v686_v60, %v610_v62 }
  0x17   :  { %409 = vmatpush.bf16.msra.mxu1 %v649_v30  ;;  %458 = vmatpush.bf16.msra.mxu2 %v653_v31 }
  0x1a   :  { %202 = vmatpush.bf16.msra.mxu0 %v680_v5  ;;  %707 = vmatpush.bf16.msra.mxu3 %v680_v5 }
  0x1b   :  { %410 = vmatpush.bf16.msra.mxu1 %v641_v36  ;;  %459 = vmatpush.bf16.msra.mxu2 %v645_v38 }
  0x1e   :  { %203 = vmatpush.bf16.msra.mxu0 %v679_v6  ;;  %708 = vmatpush.bf16.msra.mxu3 %v679_v6 }
  0x1f   :  { %411 = vmatpush.bf16.msra.mxu1 %v633_v43  ;;  %460 = vmatpush.bf16.msra.mxu2 %v637_v44 }
  0x22   :  { %204 = vmatpush.bf16.msra.mxu0 %v678_v7  ;;  %709 = vmatpush.bf16.msra.mxu3 %v678_v7 }
  0x23   :  { %412 = vmatpush.bf16.msra.mxu1 %v625_v49  ;;  %461 = vmatpush.bf16.msra.mxu2 %v629_v51 }
  0x25   :  { %205 = vmatmul.bf16.vlgmr.msra.gmra.mxu0 %v670_v8  ;;  %235 = vmatmul.bf16.vlgmr.msra.gmra.mxu3 %v676_v9 }
  0x26   :  { %710 = vmatpush.bf16.msrb.mxu3 %v665_v17 }
  0x27   :  { %413 = vmatpush.bf16.msra.mxu1 %v617_v55  ;;  %462 = vmatpush.bf16.msra.mxu2 %v621_v57 }
  0x2a   :  { %711 = vmatpush.bf16.msrb.mxu3 %v657_v24  ;;  %v321_v24 = vld [vmem:[%s1048_s3] sm:$0x3] }
  0x2b   :  { %414 = vmatpush.bf16.msra.mxu1 %v609_v61  ;;  %463 = vmatpush.bf16.msra.mxu2 %v613_v63  ;;  %v919_v28 = vperm.slane %v321_v24, 1 }
  0x2e   :  { %712 = vmatpush.bf16.msrb.mxu3 %v649_v30 }
  0x32   :  { %713 = vmatpush.bf16.msrb.mxu3 %v641_v36 }
  0x35   :  { %210 = vmatmul.bf16.gmra.mxu0 %v671_v10  ;;  %240 = vmatmul.bf16.gmra.mxu3 %v677_v11 }
  0x36   :  { %714 = vmatpush.bf16.msrb.mxu3 %v633_v43 }
  0x3a   :  { %715 = vmatpush.bf16.msrb.mxu3 %v625_v49 }
  0x3e   :  { %716 = vmatpush.bf16.msrb.mxu3 %v617_v55 }
  0x42   :  { %717 = vmatpush.bf16.msrb.mxu3 %v609_v61 }
  0x45   :  { %215 = vmatmul.bf16.gmra.mxu0 %v672_v12 }
  0x46   :  { %718 = vmatpush.bf16.msra.mxu3 %v828_v21 }
  0x4a   :  { %719 = vmatpush.bf16.msra.mxu3 %v661_v25  ;;  %v913_v25 = vperm.slane %v321_v24, 0 }
  0x4e   :  { %720 = vmatpush.bf16.msra.mxu3 %v653_v31 }
  0x52   :  { %721 = vmatpush.bf16.msra.mxu3 %v645_v38 }
  0x55   :  { %220 = vmatmul.bf16.gmra.mxu0 %v673_v13 }
  0x56   :  { %722 = vmatpush.bf16.msra.mxu3 %v637_v44 }
  0x5a   :  { %723 = vmatpush.bf16.msra.mxu3 %v629_v51 }
  0x5e   :  { %724 = vmatpush.bf16.msra.mxu3 %v621_v57 }
  0x62   :  { %725 = vmatpush.bf16.msra.mxu3 %v613_v63 }
  0x65   :  { %225 = vmatmul.bf16.gmra.mxu0 %v674_v37 }
  0x75   :  { %230 = vmatmul.bf16.gmra.mxu0 %v675_v45 }
  0xa2   :  { %v206_v0 = vpop.f32.mrf.mxu0 }
  0xa8   :  { %v236_v1 = vpop.f32.mrf.mxu3 }
  0xaa   :  { %v208_v2 = vpop.f32.mrf.mxu0 }
  0xab   :  { %v297_v3 = vpack.c.bf16 %v208_v2, %v206_v0 }
  0xad   :  { %415 = vmatmul.bf16.vlgmr.msra.gmra.mxu1 %v297_v3  ;;  %464 = vmatmul.bf16.vlgmr.msra.gmra.mxu2 %v297_v3 }
  0xb0   :  { %v238_v4 = vpop.f32.mrf.mxu3 }
  0xb1   :  { %v303_v5 = vpack.c.bf16 %v238_v4, %v236_v1 }
  0xb2   :  { %v211_v6 = vpop.f32.mrf.mxu0 }
  0xb3   :  { %445 = vmatmul.bf16.vlgmr.msrb.gmra.mxu3 %v303_v5 }
  0xb8   :  { %v241_v7 = vpop.f32.mrf.mxu3 }
  0xba   :  { %v213_v8 = vpop.f32.mrf.mxu0 }
  0xbb   :  { %v298_v9 = vpack.c.bf16 %v213_v8, %v211_v6 }
  0xbd   :  { %420 = vmatmul.bf16.gmra.mxu1 %v298_v9  ;;  %469 = vmatmul.bf16.gmra.mxu2 %v298_v9 }
  0xc0   :  { %v243_v10 = vpop.f32.mrf.mxu3 }
  0xc1   :  { %v304_v11 = vpack.c.bf16 %v243_v10, %v241_v7 }
  0xc2   :  { %v216_v12 = vpop.f32.mrf.mxu0 }
  0xc3   :  { %450 = vmatmul.bf16.gmra.mxu3 %v304_v11 }
  0xca   :  { %v218_v13 = vpop.f32.mrf.mxu0 }
  0xcb   :  { %v299_v14 = vpack.c.bf16 %v218_v13, %v216_v12 }
  0xcd   :  { %425 = vmatmul.bf16.gmra.mxu1 %v299_v14  ;;  %474 = vmatmul.bf16.gmra.mxu2 %v299_v14 }
  0xd2   :  { %v221_v15 = vpop.f32.mrf.mxu0 }
  0xd3   :  { %494 = vmatmul.bf16.vlgmr.msra.gmra.mxu3 %v303_v5 }
  0xda   :  { %v223_v16 = vpop.f32.mrf.mxu0 }
  0xdb   :  { %v300_v17 = vpack.c.bf16 %v223_v16, %v221_v15 }
  0xdd   :  { %430 = vmatmul.bf16.gmra.mxu1 %v300_v17  ;;  %479 = vmatmul.bf16.gmra.mxu2 %v300_v17 }
  0xe2   :  { %v226_v18 = vpop.f32.mrf.mxu0 }
  0xe3   :  { %499 = vmatmul.bf16.gmra.mxu3 %v304_v11 }
  0xea   :  { %v228_v19 = vpop.f32.mrf.mxu0 }
  0xeb   :  { %v301_v20 = vpack.c.bf16 %v228_v19, %v226_v18 }
  0xed   :  { %435 = vmatmul.bf16.gmra.mxu1 %v301_v20  ;;  %484 = vmatmul.bf16.gmra.mxu2 %v301_v20 }
  0xf2   :  { %v231_v21 = vpop.f32.mrf.mxu0 }
  0xfa   :  { %v233_v22 = vpop.f32.mrf.mxu0 }
  0xfb   :  { %v302_v23 = vpack.c.bf16 %v233_v22, %v231_v21 }
  0xfd   :  { %440 = vmatmul.bf16.gmra.mxu1 %v302_v23  ;;  %489 = vmatmul.bf16.gmra.mxu2 %v302_v23 }
 0x12a   :  { %v416_v26 = vpop.f32.mrf.mxu1 }
 0x12b   :  { %v417_v27 = vadd.f32 %v416_v26, %v913_v25 }
 0x12d   :  { %505 = vst [vmem:[%s1049_s4] sm:$0xff] %v417_v27 }
 0x130   :  { %v465_v29 = vpop.f32.mrf.mxu2 }
 0x131   :  { %v466_v30 = vadd.f32 %v465_v29, %v919_v28 }
 0x132   :  { %v418_v31 = vpop.f32.mrf.mxu1 }
 0x133   :  { %506 = vst [vmem:[%s1049_s4 + $0x8] sm:$0xff] %v466_v30  ;;  %v419_v32 = vadd.f32 %v418_v31, %v913_v25 }
 0x135   :  { %507 = vst [vmem:[%s1049_s4 + $0x10] sm:$0xff] %v419_v32 }
 0x136   :  { %v446_v33 = vpop.f32.mrf.mxu3 }
 0x137   :  { %v447_v34 = vadd.f32 %v446_v33, %v913_v25 }
 0x138   :  { %v467_v35 = vpop.f32.mrf.mxu2 }
 0x139   :  { %529 = vst [vmem:[%s1049_s4 + $0xc0] sm:$0xff] %v447_v34  ;;  %v468_v36 = vadd.f32 %v467_v35, %v919_v28 }
 0x13a   :  { %v421_v37 = vpop.f32.mrf.mxu1 }
 0x13b   :  { %508 = vst [vmem:[%s1049_s4 + $0x18] sm:$0xff] %v468_v36  ;;  %v422_v38 = vadd.f32 %v421_v37, %v913_v25 }
 0x13d   :  { %509 = vst [vmem:[%s1049_s4 + $0x20] sm:$0xff] %v422_v38 }
 0x13e   :  { %v448_v39 = vpop.f32.mrf.mxu3 }
 0x13f   :  { %v449_v40 = vadd.f32 %v448_v39, %v913_v25 }
 0x140   :  { %v470_v41 = vpop.f32.mrf.mxu2 }
 0x141   :  { %531 = vst [vmem:[%s1049_s4 + $0xd0] sm:$0xff] %v449_v40  ;;  %v471_v42 = vadd.f32 %v470_v41, %v919_v28 }
 0x142   :  { %v423_v43 = vpop.f32.mrf.mxu1 }
 0x143   :  { %510 = vst [vmem:[%s1049_s4 + $0x28] sm:$0xff] %v471_v42  ;;  %v424_v44 = vadd.f32 %v423_v43, %v913_v25 }
 0x145   :  { %511 = vst [vmem:[%s1049_s4 + $0x30] sm:$0xff] %v424_v44 }
 0x146   :  { %v451_v45 = vpop.f32.mrf.mxu3 }
 0x147   :  { %v452_v46 = vadd.f32 %v451_v45, %v913_v25 }
 0x148   :  { %v472_v47 = vpop.f32.mrf.mxu2 }
 0x149   :  { %533 = vst [vmem:[%s1049_s4 + $0xe0] sm:$0xff] %v452_v46  ;;  %v473_v48 = vadd.f32 %v472_v47, %v919_v28 }
 0x14a   :  { %v426_v49 = vpop.f32.mrf.mxu1 }
 0x14b   :  { %512 = vst [vmem:[%s1049_s4 + $0x38] sm:$0xff] %v473_v48  ;;  %v427_v50 = vadd.f32 %v426_v49, %v913_v25 }
 0x14d   :  { %513 = vst [vmem:[%s1049_s4 + $0x40] sm:$0xff] %v427_v50 }
 0x14e   :  { %v453_v51 = vpop.f32.mrf.mxu3 }
 0x14f   :  { %v454_v52 = vadd.f32 %v453_v51, %v913_v25 }
 0x150   :  { %v475_v53 = vpop.f32.mrf.mxu2 }
 0x151   :  { %535 = vst [vmem:[%s1049_s4 + $0xf0] sm:$0xff] %v454_v52  ;;  %v476_v54 = vadd.f32 %v475_v53, %v919_v28 }
 0x152   :  { %v428_v55 = vpop.f32.mrf.mxu1 }
 0x153   :  { %514 = vst [vmem:[%s1049_s4 + $0x48] sm:$0xff] %v476_v54  ;;  %v429_v56 = vadd.f32 %v428_v55, %v913_v25 }
 0x155   :  { %515 = vst [vmem:[%s1049_s4 + $0x50] sm:$0xff] %v429_v56 }
 0x156   :  { %v495_v57 = vpop.f32.mrf.mxu3 }
 0x157   :  { %v496_v58 = vadd.f32 %v495_v57, %v919_v28 }
 0x158   :  { %v477_v59 = vpop.f32.mrf.mxu2 }
 0x159   :  { %530 = vst [vmem:[%s1049_s4 + $0xc8] sm:$0xff] %v496_v58  ;;  %v478_v60 = vadd.f32 %v477_v59, %v919_v28 }
 0x15a   :  { %v431_v61 = vpop.f32.mrf.mxu1 }
 0x15b   :  { %516 = vst [vmem:[%s1049_s4 + $0x58] sm:$0xff] %v478_v60  ;;  %v432_v62 = vadd.f32 %v431_v61, %v913_v25 }
 0x15d   :  { %517 = vst [vmem:[%s1049_s4 + $0x60] sm:$0xff] %v432_v62 }
 0x15e   :  { %v497_v63 = vpop.f32.mrf.mxu3 }
 0x15f   :  { %v498_v0 = vadd.f32 %v497_v63, %v919_v28 }
 0x160   :  { %v480_v1 = vpop.f32.mrf.mxu2 }
 0x161   :  { %532 = vst [vmem:[%s1049_s4 + $0xd8] sm:$0xff] %v498_v0  ;;  %v481_v2 = vadd.f32 %v480_v1, %v919_v28 }
 0x162   :  { %v433_v3 = vpop.f32.mrf.mxu1 }
 0x163   :  { %518 = vst [vmem:[%s1049_s4 + $0x68] sm:$0xff] %v481_v2  ;;  %v434_v4 = vadd.f32 %v433_v3, %v913_v25 }
 0x165   :  { %519 = vst [vmem:[%s1049_s4 + $0x70] sm:$0xff] %v434_v4 }
 0x166   :  { %v500_v5 = vpop.f32.mrf.mxu3 }
 0x167   :  { %v501_v6 = vadd.f32 %v500_v5, %v919_v28 }
 0x168   :  { %v482_v7 = vpop.f32.mrf.mxu2 }
 0x169   :  { %534 = vst [vmem:[%s1049_s4 + $0xe8] sm:$0xff] %v501_v6  ;;  %v483_v8 = vadd.f32 %v482_v7, %v919_v28 }
 0x16a   :  { %v436_v9 = vpop.f32.mrf.mxu1 }
 0x16b   :  { %520 = vst [vmem:[%s1049_s4 + $0x78] sm:$0xff] %v483_v8  ;;  %v437_v10 = vadd.f32 %v436_v9, %v913_v25 }
 0x16d   :  { %521 = vst [vmem:[%s1049_s4 + $0x80] sm:$0xff] %v437_v10 }
 0x16e   :  { %v502_v11 = vpop.f32.mrf.mxu3 }
 0x16f   :  { %v503_v12 = vadd.f32 %v502_v11, %v919_v28 }
 0x170   :  { %v485_v13 = vpop.f32.mrf.mxu2 }
 0x171   :  { %536 = vst [vmem:[%s1049_s4 + $0xf8] sm:$0xff] %v503_v12  ;;  %v486_v14 = vadd.f32 %v485_v13, %v919_v28 }
 0x172   :  { %v438_v15 = vpop.f32.mrf.mxu1 }
 0x173   :  { %522 = vst [vmem:[%s1049_s4 + $0x88] sm:$0xff] %v486_v14  ;;  %v439_v16 = vadd.f32 %v438_v15, %v913_v25 }
 0x175   :  { %523 = vst [vmem:[%s1049_s4 + $0x90] sm:$0xff] %v439_v16 }
 0x178   :  { %v487_v17 = vpop.f32.mrf.mxu2 }
 0x179   :  { %v488_v18 = vadd.f32 %v487_v17, %v919_v28 }
 0x17a   :  { %v441_v19 = vpop.f32.mrf.mxu1 }
 0x17b   :  { %524 = vst [vmem:[%s1049_s4 + $0x98] sm:$0xff] %v488_v18  ;;  %v442_v20 = vadd.f32 %v441_v19, %v913_v25 }
 0x17d   :  { %525 = vst [vmem:[%s1049_s4 + $0xa0] sm:$0xff] %v442_v20 }
 0x180   :  { %v490_v21 = vpop.f32.mrf.mxu2 }
 0x181   :  { %v491_v22 = vadd.f32 %v490_v21, %v919_v28 }
 0x182   :  { %v443_v23 = vpop.f32.mrf.mxu1 }
 0x183   :  { %526 = vst [vmem:[%s1049_s4 + $0xa8] sm:$0xff] %v491_v22  ;;  %v444_v24 = vadd.f32 %v443_v23, %v913_v25 }
 0x185   :  { %527 = vst [vmem:[%s1049_s4 + $0xb0] sm:$0xff] %v444_v24 }
 0x188   :  { %v492_v26 = vpop.f32.mrf.mxu2 }
 0x189   :  { %v493_v27 = vadd.f32 %v492_v26, %v919_v28 }
 0x18b   :  { %528 = vst [vmem:[%s1049_s4 + $0xb8] sm:$0xff] %v493_v27 }
 0x18c   :  { %541 = vsyncpa [#allocation4], 1 }

</bundles_post_ra>
